<compile_context>
chip_gen: v7x
topology: tpu7x:2x2x1
jax: 0.10.0
libtpu: 0.0.40
codegen_flags: <defaults>
</compile_context>

<pallas_src>
import math

import jax
import jax.numpy as jnp
from jax.experimental import pallas as pl
from jax.experimental.pallas import tpu as pltpu

INPUT_DIM = 32
BATCH = 8
BN_EPS = 1e-5
NEG_SLOPE = 0.01      # nn.LeakyReLU default
OUT_DIM = 2

PAD = 128             # lane padding for the 64-wide / 2-wide layers
MAX_TILE_B = 256      # MXU rows on v6e/v7x; also fine (2x128) on v5e

# static, 128-lane-aligned offsets of the packed (folded, padded) bias vectors
B0_OFF, B1_OFF, B2_OFF, B3_OFF, BR_OFF, BO_OFF = 0, 128, 384, 512, 640, 768
B_TOTAL = 896


def _leaky(v):
    return jnp.where(v > 0, v, NEG_SLOPE * v)


def _round_up(n, m):
    return ((n + m - 1) // m) * m


# ----------------------------- kernel -------------------------------------- #

def make_kernel(matmul_dtype):
    def mlp_kernel(x_ref, w0_ref, w1_ref, w2_ref, w3_ref, wr_ref, wo_ref,
                   b_ref, o_ref):
        def dense(h, w_ref, off, width):
            acc = jnp.dot(h.astype(matmul_dtype), w_ref[...],
                          preferred_element_type=jnp.float32)
            return acc + b_ref[:, off:off + width]

        x = x_ref[...]
        h = _leaky(dense(x, w0_ref, B0_OFF, 128))   # input layer + LeakyReLU
        h = _leaky(dense(h, w1_ref, B1_OFF, 256))   # Linear+BN+LeakyReLU (+Dropout=id)
        h = _leaky(dense(h, w2_ref, B2_OFF, 128))
        h = _leaky(dense(h, w3_ref, B3_OFF, PAD))
        r = _leaky(dense(h, wr_ref, BR_OFF, PAD))   # residual block
        h = h + r
        o_ref[...] = dense(h, wo_ref, BO_OFF, PAD).astype(o_ref.dtype)

    return mlp_kernel


def complex_tabular_forward(x, params, use_bf16=False):
    """x: (batch, INPUT_DIM) f32; params: folded/padded tuple from fold_params."""
    w0, w1, w2, w3, wr, wo, bpack = params
    n = x.shape[0]
    tile_b = min(MAX_TILE_B, _round_up(n, 8))
    n_pad = _round_up(n, tile_b)
    if n_pad != n:
        x = jnp.pad(x, ((0, n_pad - n), (0, 0)))

    matmul_dtype = jnp.bfloat16 if use_bf16 else jnp.float32
    weights = [w.astype(matmul_dtype) for w in (w0, w1, w2, w3, wr, wo)]

    const_map = lambda i: (0, 0)   # weights / packed bias stay VMEM-resident
    row_map = lambda i: (i, 0)     # batch row tiles

    grid_spec = pltpu.PrefetchScalarGridSpec(
        num_scalar_prefetch=0,
        grid=(n_pad // tile_b,),
        in_specs=(
            [pl.BlockSpec((tile_b, INPUT_DIM), row_map)]
            + [pl.BlockSpec(w.shape, const_map) for w in weights]
            + [pl.BlockSpec((1, B_TOTAL), const_map)]
        ),
        out_specs=pl.BlockSpec((tile_b, PAD), row_map),
    )

    out = pl.pallas_call(
        make_kernel(matmul_dtype),
        out_shape=jax.ShapeDtypeStruct((n_pad, PAD), jnp.float32),
        grid_spec=grid_spec,
        compiler_params=pltpu.CompilerParams(
            dimension_semantics=("parallel",)),
    )(x, *weights, bpack)
    return out[:n, :OUT_DIM]


# --------------------------- parameters ------------------------------------ #

def _linear_init(key, fan_in, fan_out):
    kw, kb = jax.random.split(key)
    bound = 1.0 / math.sqrt(fan_in)
    w = jax.random.uniform(kw, (fan_in, fan_out), jnp.float32, -bound, bound)
    b = jax.random.uniform(kb, (fan_out,), jnp.float32, -bound, bound)
    return w, b


def _bn_init(key, dim):
    kg, kb, km, kv = jax.random.split(key, 4)
    gamma = 1.0 + 0.1 * jax.random.normal(kg, (dim,), jnp.float32)
    beta = 0.1 * jax.random.normal(kb, (dim,), jnp.float32)
    mean = 0.1 * jax.random.normal(km, (dim,), jnp.float32)
    var = 1.0 + 0.1 * jnp.abs(jax.random.normal(kv, (dim,), jnp.float32))
    return gamma, beta, mean, var


def make_raw_params(key):
    keys = jax.random.split(key, 10)
    return dict(
        lin0=_linear_init(keys[0], INPUT_DIM, 128),
        lin1=_linear_init(keys[1], 128, 256), bn1=_bn_init(keys[2], 256),
        lin2=_linear_init(keys[3], 256, 128), bn2=_bn_init(keys[4], 128),
        lin3=_linear_init(keys[5], 128, 64),  bn3=_bn_init(keys[6], 64),
        linr=_linear_init(keys[7], 64, 64),   bnr=_bn_init(keys[8], 64),
        lino=_linear_init(keys[9], 64, 2),
    )


def _fold(lin, bn=None):
    """Fold eval-mode BatchNorm into the preceding Linear's weight/bias."""
    w, b = lin
    if bn is None:
        return w, b
    g, beta, mean, var = bn
    s = g / jnp.sqrt(var + BN_EPS)
    t = beta - mean * s
    return w * s[None, :], b * s + t


def _pad_w(w, rows, cols):
    return jnp.pad(w, ((0, rows - w.shape[0]), (0, cols - w.shape[1])))


def _pad_b(b, cols):
    return jnp.pad(b, (0, cols - b.shape[0]))


def fold_params(raw):
    w0, b0 = _fold(raw["lin0"])
    w1, b1 = _fold(raw["lin1"], raw["bn1"])
    w2, b2 = _fold(raw["lin2"], raw["bn2"])
    w3, b3 = _fold(raw["lin3"], raw["bn3"])
    wr, br = _fold(raw["linr"], raw["bnr"])
    wo, bo = _fold(raw["lino"])

    # zero-pad the 64-wide / 2-wide layers to 128 lanes (lane-dense matmuls)
    w3 = _pad_w(w3, 128, PAD); b3 = _pad_b(b3, PAD)
    wr = _pad_w(wr, PAD, PAD); br = _pad_b(br, PAD)
    wo = _pad_w(wo, PAD, PAD); bo = _pad_b(bo, PAD)

    bpack = jnp.concatenate([b0, b1, b2, b3, br, bo]).reshape(1, B_TOTAL)
    return w0, w1, w2, w3, wr, wo, bpack


# --------------------------- reference ------------------------------------- #

def reference_forward(x, raw):
    hi = jax.lax.Precision.HIGHEST

    def bn(z, p):
        g, beta, mean, var = p
        return (z - mean) / jnp.sqrt(var + BN_EPS) * g + beta

    def lin(h, p):
        w, b = p
        return jnp.dot(h, w, precision=hi) + b

    h = _leaky(lin(x, raw["lin0"]))
    h = _leaky(bn(lin(h, raw["lin1"]), raw["bn1"]))
    h = _leaky(bn(lin(h, raw["lin2"]), raw["bn2"]))
    h = _leaky(bn(lin(h, raw["lin3"]), raw["bn3"]))
    r = _leaky(bn(lin(h, raw["linr"]), raw["bnr"]))
    h = h + r
    return lin(h, raw["lino"])


# ------------------------------ main ---------------------------------------- #

if __name__ == "__main__":
    key = jax.random.PRNGKey(0)
    kx, kp = jax.random.split(key)
    x = jax.random.normal(kx, (BATCH, INPUT_DIM), jnp.float32)
    raw = make_raw_params(kp)
    params = fold_params(raw)

    ref = reference_forward(x, raw)

    # f32 matmul path (bit-faithful to the PyTorch eval-mode forward)
    out = jax.block_until_ready(complex_tabular_forward(x, params))
    assert out.shape == (BATCH, OUT_DIM)
    assert jnp.allclose(out, ref, atol=1e-4, rtol=1e-4)

    # bf16 matmul-operand path (v6e/v7x recipe, f32 accumulation + elementwise)
    out_bf16 = jax.block_until_ready(
        complex_tabular_forward(x, params, use_bf16=True))
    assert out_bf16.shape == (BATCH, OUT_DIM)
    assert jnp.allclose(out_bf16, ref, atol=5e-2, rtol=5e-2)

    print("KERNEL_OK")
</pallas_src>

<mosaic_0001>
module attributes {stable_mosaic.version = 11 : i64} {
  func.func @mlp_kernel(%arg0: i32, %arg1: memref<8x32xf32, #tpu.memory_space<vmem>>, %arg2: memref<32x128xf32, #tpu.memory_space<vmem>>, %arg3: memref<128x256xf32, #tpu.memory_space<vmem>>, %arg4: memref<256x128xf32, #tpu.memory_space<vmem>>, %arg5: memref<128x128xf32, #tpu.memory_space<vmem>>, %arg6: memref<128x128xf32, #tpu.memory_space<vmem>>, %arg7: memref<128x128xf32, #tpu.memory_space<vmem>>, %arg8: memref<1x896xf32, #tpu.memory_space<vmem>>, %arg9: memref<8x128xf32, #tpu.memory_space<vmem>>) attributes {dimension_semantics = [#tpu.dimension_semantics<parallel>], iteration_bounds = array<i64: 1>, scalar_prefetch = 0 : i64, scratch_operands = 0 : i64, tpu.core_type = #tpu.core_type<tc>, window_params = [{transform_indices = @transform_0, window_bounds = array<i64: 8, 32>}, {pipeline_mode = #tpu.pipeline_mode<synchronous>, transform_indices = @transform_1, window_bounds = array<i64: 32, 128>}, {pipeline_mode = #tpu.pipeline_mode<synchronous>, transform_indices = @transform_2, window_bounds = array<i64: 128, 256>}, {pipeline_mode = #tpu.pipeline_mode<synchronous>, transform_indices = @transform_3, window_bounds = array<i64: 256, 128>}, {pipeline_mode = #tpu.pipeline_mode<synchronous>, transform_indices = @transform_4, window_bounds = array<i64: 128, 128>}, {pipeline_mode = #tpu.pipeline_mode<synchronous>, transform_indices = @transform_5, window_bounds = array<i64: 128, 128>}, {pipeline_mode = #tpu.pipeline_mode<synchronous>, transform_indices = @transform_6, window_bounds = array<i64: 128, 128>}, {pipeline_mode = #tpu.pipeline_mode<synchronous>, transform_indices = @transform_7, window_bounds = array<i64: 1, 896>}, {transform_indices = @transform_8, window_bounds = array<i64: 8, 128>}]} {
    %c0 = arith.constant 0 : index
    %c0_0 = arith.constant 0 : index
    %0 = vector.load %arg1[%c0, %c0_0] : memref<8x32xf32, #tpu.memory_space<vmem>>, vector<8x32xf32>
    %c0_1 = arith.constant 0 : index
    %c0_2 = arith.constant 0 : index
    %1 = vector.load %arg2[%c0_1, %c0_2] : memref<32x128xf32, #tpu.memory_space<vmem>>, vector<32x128xf32>
    %cst = arith.constant dense<0.000000e+00> : vector<8x128xf32>
    %2 = tpu.matmul %0, %1, %cst {dimension_numbers = #tpu.dot_dimension_numbers<[1], [0], [0], [1], [0, 0, 1, 1], [], []>} : vector<8x32xf32>, vector<32x128xf32>, vector<8x128xf32> -> vector<8x128xf32>
    %c0_3 = arith.constant 0 : index
    %c0_4 = arith.constant 0 : index
    %3 = vector.load %arg8[%c0_3, %c0_4] : memref<1x896xf32, #tpu.memory_space<vmem>>, vector<1x128xf32>
    %4 = vector.broadcast %3 : vector<1x128xf32> to vector<8x128xf32>
    %5 = arith.addf %2, %4 : vector<8x128xf32>
    %cst_5 = arith.constant 0.000000e+00 : f32
    %6 = vector.broadcast %cst_5 : f32 to vector<8x128xf32>
    %7 = arith.cmpf ogt, %5, %6 : vector<8x128xf32>
    %cst_6 = arith.constant 0.00999999977 : f32
    %8 = vector.broadcast %cst_6 : f32 to vector<8x128xf32>
    %9 = arith.mulf %8, %5 : vector<8x128xf32>
    %10 = arith.select %7, %5, %9 : vector<8x128xi1>, vector<8x128xf32>
    %c0_7 = arith.constant 0 : index
    %c0_8 = arith.constant 0 : index
    %11 = vector.load %arg3[%c0_7, %c0_8] : memref<128x256xf32, #tpu.memory_space<vmem>>, vector<128x256xf32>
    %cst_9 = arith.constant dense<0.000000e+00> : vector<8x256xf32>
    %12 = tpu.matmul %10, %11, %cst_9 {dimension_numbers = #tpu.dot_dimension_numbers<[1], [0], [0], [1], [0, 0, 1, 1], [], []>} : vector<8x128xf32>, vector<128x256xf32>, vector<8x256xf32> -> vector<8x256xf32>
    %c0_10 = arith.constant 0 : index
    %c128 = arith.constant 128 : index
    %13 = vector.load %arg8[%c0_10, %c128] : memref<1x896xf32, #tpu.memory_space<vmem>>, vector<1x256xf32>
    %14 = vector.broadcast %13 : vector<1x256xf32> to vector<8x256xf32>
    %15 = arith.addf %12, %14 : vector<8x256xf32>
    %cst_11 = arith.constant 0.000000e+00 : f32
    %16 = vector.broadcast %cst_11 : f32 to vector<8x256xf32>
    %17 = arith.cmpf ogt, %15, %16 : vector<8x256xf32>
    %cst_12 = arith.constant 0.00999999977 : f32
    %18 = vector.broadcast %cst_12 : f32 to vector<8x256xf32>
    %19 = arith.mulf %18, %15 : vector<8x256xf32>
    %20 = arith.select %17, %15, %19 : vector<8x256xi1>, vector<8x256xf32>
    %c0_13 = arith.constant 0 : index
    %c0_14 = arith.constant 0 : index
    %21 = vector.load %arg4[%c0_13, %c0_14] : memref<256x128xf32, #tpu.memory_space<vmem>>, vector<256x128xf32>
    %cst_15 = arith.constant dense<0.000000e+00> : vector<8x128xf32>
    %22 = tpu.matmul %20, %21, %cst_15 {dimension_numbers = #tpu.dot_dimension_numbers<[1], [0], [0], [1], [0, 0, 1, 1], [], []>} : vector<8x256xf32>, vector<256x128xf32>, vector<8x128xf32> -> vector<8x128xf32>
    %c0_16 = arith.constant 0 : index
    %c384 = arith.constant 384 : index
    %23 = vector.load %arg8[%c0_16, %c384] : memref<1x896xf32, #tpu.memory_space<vmem>>, vector<1x128xf32>
    %24 = vector.broadcast %23 : vector<1x128xf32> to vector<8x128xf32>
    %25 = arith.addf %22, %24 : vector<8x128xf32>
    %cst_17 = arith.constant 0.000000e+00 : f32
    %26 = vector.broadcast %cst_17 : f32 to vector<8x128xf32>
    %27 = arith.cmpf ogt, %25, %26 : vector<8x128xf32>
    %cst_18 = arith.constant 0.00999999977 : f32
    %28 = vector.broadcast %cst_18 : f32 to vector<8x128xf32>
    %29 = arith.mulf %28, %25 : vector<8x128xf32>
    %30 = arith.select %27, %25, %29 : vector<8x128xi1>, vector<8x128xf32>
    %c0_19 = arith.constant 0 : index
    %c0_20 = arith.constant 0 : index
    %31 = vector.load %arg5[%c0_19, %c0_20] : memref<128x128xf32, #tpu.memory_space<vmem>>, vector<128x128xf32>
    %cst_21 = arith.constant dense<0.000000e+00> : vector<8x128xf32>
    %32 = tpu.matmul %30, %31, %cst_21 {dimension_numbers = #tpu.dot_dimension_numbers<[1], [0], [0], [1], [0, 0, 1, 1], [], []>} : vector<8x128xf32>, vector<128x128xf32>, vector<8x128xf32> -> vector<8x128xf32>
    %c0_22 = arith.constant 0 : index
    %c512 = arith.constant 512 : index
    %33 = vector.load %arg8[%c0_22, %c512] : memref<1x896xf32, #tpu.memory_space<vmem>>, vector<1x128xf32>
    %34 = vector.broadcast %33 : vector<1x128xf32> to vector<8x128xf32>
    %35 = arith.addf %32, %34 : vector<8x128xf32>
    %cst_23 = arith.constant 0.000000e+00 : f32
    %36 = vector.broadcast %cst_23 : f32 to vector<8x128xf32>
    %37 = arith.cmpf ogt, %35, %36 : vector<8x128xf32>
    %cst_24 = arith.constant 0.00999999977 : f32
    %38 = vector.broadcast %cst_24 : f32 to vector<8x128xf32>
    %39 = arith.mulf %38, %35 : vector<8x128xf32>
    %40 = arith.select %37, %35, %39 : vector<8x128xi1>, vector<8x128xf32>
    %c0_25 = arith.constant 0 : index
    %c0_26 = arith.constant 0 : index
    %41 = vector.load %arg6[%c0_25, %c0_26] : memref<128x128xf32, #tpu.memory_space<vmem>>, vector<128x128xf32>
    %cst_27 = arith.constant dense<0.000000e+00> : vector<8x128xf32>
    %42 = tpu.matmul %40, %41, %cst_27 {dimension_numbers = #tpu.dot_dimension_numbers<[1], [0], [0], [1], [0, 0, 1, 1], [], []>} : vector<8x128xf32>, vector<128x128xf32>, vector<8x128xf32> -> vector<8x128xf32>
    %c0_28 = arith.constant 0 : index
    %c640 = arith.constant 640 : index
    %43 = vector.load %arg8[%c0_28, %c640] : memref<1x896xf32, #tpu.memory_space<vmem>>, vector<1x128xf32>
    %44 = vector.broadcast %43 : vector<1x128xf32> to vector<8x128xf32>
    %45 = arith.addf %42, %44 : vector<8x128xf32>
    %cst_29 = arith.constant 0.000000e+00 : f32
    %46 = vector.broadcast %cst_29 : f32 to vector<8x128xf32>
    %47 = arith.cmpf ogt, %45, %46 : vector<8x128xf32>
    %cst_30 = arith.constant 0.00999999977 : f32
    %48 = vector.broadcast %cst_30 : f32 to vector<8x128xf32>
    %49 = arith.mulf %48, %45 : vector<8x128xf32>
    %50 = arith.select %47, %45, %49 : vector<8x128xi1>, vector<8x128xf32>
    %51 = arith.addf %40, %50 : vector<8x128xf32>
    %c0_31 = arith.constant 0 : index
    %c0_32 = arith.constant 0 : index
    %52 = vector.load %arg7[%c0_31, %c0_32] : memref<128x128xf32, #tpu.memory_space<vmem>>, vector<128x128xf32>
    %cst_33 = arith.constant dense<0.000000e+00> : vector<8x128xf32>
    %53 = tpu.matmul %51, %52, %cst_33 {dimension_numbers = #tpu.dot_dimension_numbers<[1], [0], [0], [1], [0, 0, 1, 1], [], []>} : vector<8x128xf32>, vector<128x128xf32>, vector<8x128xf32> -> vector<8x128xf32>
    %c0_34 = arith.constant 0 : index
    %c768 = arith.constant 768 : index
    %54 = vector.load %arg8[%c0_34, %c768] : memref<1x896xf32, #tpu.memory_space<vmem>>, vector<1x128xf32>
    %55 = vector.broadcast %54 : vector<1x128xf32> to vector<8x128xf32>
    %56 = arith.addf %53, %55 : vector<8x128xf32>
    %c0_35 = arith.constant 0 : index
    %c0_36 = arith.constant 0 : index
    %57 = vector.load %arg9[%c0_35, %c0_36] : memref<8x128xf32, #tpu.memory_space<vmem>>, vector<8x128xf32>
    tpu.vector_store %arg9[%c0_35, %c0_36], %56 {strides = array<i32>} : memref<8x128xf32, #tpu.memory_space<vmem>>, vector<8x128xf32>,
    return
  }
  func.func @transform_0(%arg0: i32) -> (i32, i32) {
    %c0_i32 = arith.constant 0 : i32
    %c0_i32_0 = arith.constant 0 : i32
    return %arg0, %c0_i32 : i32, i32
  }
  func.func @transform_1(%arg0: i32) -> (i32, i32) {
    %c0_i32 = arith.constant 0 : i32
    %c0_i32_0 = arith.constant 0 : i32
    %c0_i32_1 = arith.constant 0 : i32
    return %c0_i32, %c0_i32_0 : i32, i32
  }
  func.func @transform_2(%arg0: i32) -> (i32, i32) {
    %c0_i32 = arith.constant 0 : i32
    %c0_i32_0 = arith.constant 0 : i32
    %c0_i32_1 = arith.constant 0 : i32
    return %c0_i32, %c0_i32_0 : i32, i32
  }
  func.func @transform_3(%arg0: i32) -> (i32, i32) {
    %c0_i32 = arith.constant 0 : i32
    %c0_i32_0 = arith.constant 0 : i32
    %c0_i32_1 = arith.constant 0 : i32
    return %c0_i32, %c0_i32_0 : i32, i32
  }
  func.func @transform_4(%arg0: i32) -> (i32, i32) {
    %c0_i32 = arith.constant 0 : i32
    %c0_i32_0 = arith.constant 0 : i32
    %c0_i32_1 = arith.constant 0 : i32
    return %c0_i32, %c0_i32_0 : i32, i32
  }
  func.func @transform_5(%arg0: i32) -> (i32, i32) {
    %c0_i32 = arith.constant 0 : i32
    %c0_i32_0 = arith.constant 0 : i32
    %c0_i32_1 = arith.constant 0 : i32
    return %c0_i32, %c0_i32_0 : i32, i32
  }
  func.func @transform_6(%arg0: i32) -> (i32, i32) {
    %c0_i32 = arith.constant 0 : i32
    %c0_i32_0 = arith.constant 0 : i32
    %c0_i32_1 = arith.constant 0 : i32
    return %c0_i32, %c0_i32_0 : i32, i32
  }
  func.func @transform_7(%arg0: i32) -> (i32, i32) {
    %c0_i32 = arith.constant 0 : i32
    %c0_i32_0 = arith.constant 0 : i32
    %c0_i32_1 = arith.constant 0 : i32
    return %c0_i32, %c0_i32_0 : i32, i32
  }
  func.func @transform_8(%arg0: i32) -> (i32, i32) {
    %c0_i32 = arith.constant 0 : i32
    %c0_i32_0 = arith.constant 0 : i32
    return %arg0, %c0_i32 : i32, i32
  }
}

</mosaic_0001>

<bundles_post_ra>
// kernel: tpu_custom_call.1
= control target key start
LH: loop header
LB: loop body
LE: loop exit
PB: predicated region body
PF: predicated region fallthrough
CT: control target
= control target key end

     0   :  { %13 = vsyncpa [#allocation3], 0  ;;  %s1530_s0 = inlined_call_operand.hbm [shape: f32[8,32], index: 0, kind: input, shape index: {}]   ;;  %s1531_s1 = inlined_call_operand.hbm [shape: f32[32,128], index: 1, kind: input, shape index: {}]   ;;  %s1532_s2 = inlined_call_operand.hbm [shape: f32[128,256], index: 2, kind: input, shape index: {}]   ;;  %s1533_s3 = inlined_call_operand.hbm [shape: f32[256,128], index: 3, kind: input, shape index: {}]   ;;  %s1534_s4 = inlined_call_operand.hbm [shape: f32[128,128], index: 4, kind: input, shape index: {}]   ;;  %s1535_s5 = inlined_call_operand.hbm [shape: f32[128,128], index: 5, kind: input, shape index: {}]   ;;  %s1536_s6 = inlined_call_operand.hbm [shape: f32[128,128], index: 6, kind: input, shape index: {}]   ;;  %s1537_s7 = inlined_call_operand.vmem [shape: f32[1,896], index: 7, kind: input, shape index: {}]   ;;  %s1538_s8 = inlined_call_operand.hbm [shape: f32[8,128], index: 8, kind: output, shape index: {}]  }
   0x1   :  { %14 = vsyncpa [#allocation6], 0 }
   0x2   :  { %15 = vsyncpa [#allocation9], 0 }
   0x3   :  { %16 = vsyncpa [#allocation12], 0 }
   0x4   :  { %17 = vsyncpa [#allocation4], 0  ;;  %s1306_s27 = smov [#allocation5]   ;;  %s1120_s9 = scalar_lea.hbm %s1531_s1, 512 }
   0x5   :  { %s33_s28 = sshll.u32 %s1306_s27, 4  ;;  %p1121_p0 = scmp.ne.s32.totalorder %s1531_s1, %s1120_s9  ;;  %s34_s28 = int_to_ptr.vmem [resolvable:$true] %s33_s28 }
   0x6   :  { %p1124_p1 = scmp.lt.u32.totalorder %s1120_s9, %s1531_s1 }
   0x8   :  { %p1126_p2 = pnand %p1124_p1, %p1121_p0 }
   0xa   :  { %1129 = shalt.err (!%p1126_p2)
}
   0xb   :  { %s1130_s14 = scalar_lea.vmem %s34_s28, 512  ;;  %p1135_p4 = scmp.lt.s32.totalorder %s34_s28, %s34_s28 }
   0xc   :  { %p1131_p3 = scmp.ne.s32.totalorder %s34_s28, %s1130_s14  ;;  %p1136_p5 = scmp.lt.s32.totalorder %s1130_s14, %s1130_s14 }
   0xe   :  { %p1137_p6 = por %p1136_p5, %p1135_p4 }
  0x10   :  { %p1138_p7 = pnand %p1137_p6, %p1131_p3 }
  0x12   :  { %1141 = shalt.err (!%p1138_p7)
}
  0x13   :  { %s1307_s15 = smov 128   ;;  %s1308_s16 = smov 8  }
  0x14   :  { %39 = dma.hbm_to_vmem [thread:$0]  %s1531_s1, 512, %s34_s28, [#allocation6], %s1307_s15, %s1307_s15, %s1308_s16  }
  0x15   :  { %s1309_s19 = smov [#allocation8]   ;;  %s1310_s21 = smov [#allocation11]  }
  0x16   :  { %s57_s20 = sshll.u32 %s1309_s19, 4  ;;  %s81_s22 = sshll.u32 %s1310_s21, 4  ;;  %s58_s20 = int_to_ptr.vmem [resolvable:$true] %s57_s20  ;;  %s82_s22 = int_to_ptr.vmem [resolvable:$true] %s81_s22 }
  0x17   :  { %s1142_s25 = scalar_lea.hbm %s1533_s3, 4096 }
  0x18   :  { %p1143_p8 = scmp.ne.s32.totalorder %s1533_s3, %s1142_s25  ;;  %p1146_p9 = scmp.lt.u32.totalorder %s1142_s25, %s1533_s3 }
  0x1a   :  { %p1148_p10 = pnand %p1146_p9, %p1143_p8 }
  0x1c   :  { %1151 = shalt.err (!%p1148_p10)
}
  0x1d   :  { %s1152_s1 = scalar_lea.vmem %s58_s20, 4096  ;;  %p1157_p12 = scmp.lt.s32.totalorder %s58_s20, %s58_s20 }
  0x1e   :  { %p1153_p11 = scmp.ne.s32.totalorder %s58_s20, %s1152_s1  ;;  %p1158_p13 = scmp.lt.s32.totalorder %s1152_s1, %s1152_s1 }
  0x20   :  { %p1159_p0 = por %p1158_p13, %p1157_p12 }
  0x22   :  { %p1160_p1 = pnand %p1159_p0, %p1153_p11 }
  0x24   :  { %1163 = shalt.err (!%p1160_p1)
}
  0x25   :  { %63 = dma.hbm_to_vmem [thread:$0]  %s1533_s3, 4096, %s58_s20, [#allocation9], %s1307_s15, %s1307_s15, %s1308_s16  }
  0x26   :  { %s1164_s12 = scalar_lea.hbm %s1535_s5, 2048 }
  0x27   :  { %p1165_p2 = scmp.ne.s32.totalorder %s1535_s5, %s1164_s12  ;;  %p1168_p3 = scmp.lt.u32.totalorder %s1164_s12, %s1535_s5 }
  0x29   :  { %p1170_p4 = pnand %p1168_p3, %p1165_p2 }
  0x2b   :  { %1173 = shalt.err (!%p1170_p4)
}
  0x2c   :  { %s1174_s19 = scalar_lea.vmem %s82_s22, 2048  ;;  %p1179_p6 = scmp.lt.s32.totalorder %s82_s22, %s82_s22 }
  0x2d   :  { %p1175_p5 = scmp.ne.s32.totalorder %s82_s22, %s1174_s19  ;;  %p1180_p7 = scmp.lt.s32.totalorder %s1174_s19, %s1174_s19 }
  0x2f   :  { %p1181_p8 = por %p1180_p7, %p1179_p6 }
  0x31   :  { %p1182_p9 = pnand %p1181_p8, %p1175_p5 }
  0x33   :  { %1185 = shalt.err (!%p1182_p9)
}
  0x34   :  { %87 = dma.hbm_to_vmem [thread:$0]  %s1535_s5, 2048, %s82_s22, [#allocation12], %s1307_s15, %s1307_s15, %s1308_s16  }
  0x35   :  { %s1311_s21 = smov [#allocation2]   ;;  %s1312_s24 = smov [#allocation7]  }
  0x36   :  { %s24_s23 = sshll.u32 %s1311_s21, 4  ;;  %s45_s25 = sshll.u32 %s1312_s24, 4  ;;  %s25_s23 = int_to_ptr.vmem [resolvable:$true] %s24_s23  ;;  %s46_s25 = int_to_ptr.vmem [resolvable:$true] %s45_s25 }
  0x37   :  { %s1186_s29 = scalar_lea.hbm %s1530_s0, 128 }
  0x38   :  { %p1187_p10 = scmp.ne.s32.totalorder %s1530_s0, %s1186_s29  ;;  %p1190_p11 = scmp.lt.u32.totalorder %s1186_s29, %s1530_s0 }
  0x3a   :  { %p1192_p12 = pnand %p1190_p11, %p1187_p10 }
  0x3c   :  { %1195 = shalt.err (!%p1192_p12)
}
  0x3d   :  { %s1196_s5 = scalar_lea.vmem %s25_s23, 128  ;;  %p1201_p0 = scmp.lt.s32.totalorder %s25_s23, %s25_s23 }
  0x3e   :  { %p1197_p13 = scmp.ne.s32.totalorder %s25_s23, %s1196_s5  ;;  %p1202_p1 = scmp.lt.s32.totalorder %s1196_s5, %s1196_s5 }
  0x40   :  { %p1203_p2 = por %p1202_p1, %p1201_p0 }
  0x42   :  { %p1204_p3 = pnand %p1203_p2, %p1197_p13 }
  0x44   :  { %1207 = shalt.err (!%p1204_p3)
}
  0x45   :  { %27 = dma.hbm_to_vmem [thread:$0]  %s1530_s0, 128, %s25_s23, [#allocation3]  }
  0x46   :  { %s1208_s13 = scalar_lea.hbm %s1532_s2, 4096 }
  0x47   :  { %p1209_p4 = scmp.ne.s32.totalorder %s1532_s2, %s1208_s13  ;;  %p1212_p5 = scmp.lt.u32.totalorder %s1208_s13, %s1532_s2 }
  0x49   :  { %p1214_p6 = pnand %p1212_p5, %p1209_p4 }
  0x4b   :  { %1217 = shalt.err (!%p1214_p6)
}
  0x4c   :  { %s1218_s3 = scalar_lea.vmem %s46_s25, 4096  ;;  %p1223_p8 = scmp.lt.s32.totalorder %s46_s25, %s46_s25 }
  0x4d   :  { %p1219_p7 = scmp.ne.s32.totalorder %s46_s25, %s1218_s3  ;;  %p1224_p9 = scmp.lt.s32.totalorder %s1218_s3, %s1218_s3 }
  0x4f   :  { %p1225_p10 = por %p1224_p9, %p1223_p8 }
  0x51   :  { %p1226_p11 = pnand %p1225_p10, %p1219_p7 }
  0x53   :  { %1229 = shalt.err (!%p1226_p11)
}
  0x54   :  { %s1313_s0 = smov 256   ;;  %s1314_s20 = smov 16  }
  0x55   :  { %51 = dma.hbm_to_vmem [thread:$0]  %s1532_s2, 4096, %s46_s25, [#allocation6], %s1313_s0, %s1313_s0, %s1314_s20  }
  0x56   :  { %s1315_s24 = smov [#allocation10]   ;;  %s1316_s27 = smov [#allocation13]  }
  0x57   :  { %s69_s26 = sshll.u32 %s1315_s24, 4  ;;  %s93_s29 = sshll.u32 %s1316_s27, 4  ;;  %s70_s26 = int_to_ptr.vmem [resolvable:$true] %s69_s26  ;;  %s94_s29 = int_to_ptr.vmem [resolvable:$true] %s93_s29 }
  0x58   :  { %s1230_s28 = scalar_lea.hbm %s1534_s4, 2048 }
  0x59   :  { %p1231_p12 = scmp.ne.s32.totalorder %s1534_s4, %s1230_s28  ;;  %p1234_p13 = scmp.lt.u32.totalorder %s1230_s28, %s1534_s4 }
  0x5b   :  { %p1236_p0 = pnand %p1234_p13, %p1231_p12 }
  0x5d   :  { %1239 = shalt.err (!%p1236_p0)
}
  0x5e   :  { %s1240_s2 = scalar_lea.vmem %s70_s26, 2048  ;;  %p1245_p2 = scmp.lt.s32.totalorder %s70_s26, %s70_s26 }
  0x5f   :  { %p1241_p1 = scmp.ne.s32.totalorder %s70_s26, %s1240_s2  ;;  %p1246_p3 = scmp.lt.s32.totalorder %s1240_s2, %s1240_s2 }
  0x61   :  { %p1247_p4 = por %p1246_p3, %p1245_p2 }
  0x63   :  { %p1248_p5 = pnand %p1247_p4, %p1241_p1 }
  0x65   :  { %1251 = shalt.err (!%p1248_p5)
}
  0x66   :  { %75 = dma.hbm_to_vmem [thread:$0]  %s1534_s4, 2048, %s70_s26, [#allocation9], %s1307_s15, %s1307_s15, %s1308_s16  }
  0x67   :  { %s1252_s14 = scalar_lea.hbm %s1536_s6, 2048 }
  0x68   :  { %p1253_p6 = scmp.ne.s32.totalorder %s1536_s6, %s1252_s14  ;;  %p1256_p7 = scmp.lt.u32.totalorder %s1252_s14, %s1536_s6 }
  0x6a   :  { %p1258_p8 = pnand %p1256_p7, %p1253_p6 }
  0x6c   :  { %1261 = shalt.err (!%p1258_p8)
}
  0x6d   :  { %s1262_s0 = scalar_lea.vmem %s94_s29, 2048  ;;  %p1267_p10 = scmp.lt.s32.totalorder %s94_s29, %s94_s29 }
  0x6e   :  { %p1263_p9 = scmp.ne.s32.totalorder %s94_s29, %s1262_s0  ;;  %p1268_p11 = scmp.lt.s32.totalorder %s1262_s0, %s1262_s0 }
  0x70   :  { %p1269_p12 = por %p1268_p11, %p1267_p10 }
  0x72   :  { %p1270_p13 = pnand %p1269_p12, %p1263_p9 }
  0x74   :  { %1273 = shalt.err (!%p1270_p13)
}
  0x75   :  { %99 = dma.hbm_to_vmem [thread:$0]  %s1536_s6, 2048, %s94_s29, [#allocation12], %s1307_s15, %s1307_s15, %s1308_s16  }
  0x76   :  { %1296 = dma.done.wait [#allocation3], 128  }
  0x77   :  { %1297 = vsyncadd [#allocation3], 4294967168 }
  0x78   :  { %1298 = dma.done.wait [#allocation6], 4608  }
  0x79   :  { %1299 = vsyncadd [#allocation6], 4294962688 }
  0x7a   :  { %1300 = dma.done.wait [#allocation9], 6144  }
  0x7b   :  { %1301 = vsyncadd [#allocation9], 4294961152 }
  0x7c   :  { %1302 = dma.done.wait [#allocation12], 4096  }
  0x7d   :  { %1303 = vsyncadd [#allocation12], 4294963200  ;;  %v1317_v0 = vmov 0.0|0.0   ;;  %vm1318_vm0 = vmmov 0   ;;  %v1319_v1 = vmov 0.0   ;;  %v124_v2 = vld [vmem:[#allocation5] sm:$0xff] }
  0x7e   :  { %963 = vmatprep.subr.bf16.mxu0 %v1317_v0  ;;  %855 = vmatprep.mubr.msk.f32.mxu0 %vm1318_vm0, %v1319_v1  ;;  %v125_v3 = vld [vmem:[#allocation5 + $0x8] sm:$0xff]  ;;  %v126_v4 = vld [vmem:[#allocation5 + $0x10] sm:$0xff]  ;;  %v127_v6 = vld [vmem:[#allocation5 + $0x18] sm:$0xff]  ;;  %vm135_vm1 = vcmask 261120   ;;  %s1320_s9 = smov [#allocation14]  }
  0x7f   :  { %320 = vmatprep.mubr.f32.mxu1 %v1319_v1  ;;  %v964_v5 = vpack.c.bf16 %v125_v3, %v124_v2  ;;  %v213_v7 = vld [vmem:[#allocation7 + $0x8] sm:$0xff]  ;;  %v215_v8 = vld [vmem:[#allocation7 + $0x18] sm:$0xff]  ;;  %v212_v9 = vld [vmem:[#allocation7] sm:$0xff]  ;;  %v967_v11 = vpack.c.bf16 %v127_v6, %v126_v4  ;;  %s738_s5 = sshll.u32 %s1320_s9, 4  ;;  %s739_s5 = int_to_ptr.vmem [resolvable:$true] %s738_s5 }
  0x80   :  { %v214_v10 = vld [vmem:[#allocation7 + $0x10] sm:$0xff]  ;;  %v969_v12 = vpack.c.bf16 %v215_v8, %v213_v7  ;;  %v217_v14 = vld [vmem:[#allocation7 + $0x28] sm:$0xff]  ;;  %v219_v15 = vld [vmem:[#allocation7 + $0x38] sm:$0xff]  ;;  %s1274_s22 = scalar_lea.vmem %s739_s5, 128  ;;  %p1279_p1 = scmp.lt.s32.totalorder %s739_s5, %s739_s5 }
  0x81   :  { %965 = vmatpush3.bf16.msra.mxu0 %v964_v5  ;;  %v971_v13 = vpack.c.bf16 %v214_v10, %v212_v9  ;;  %v216_v16 = vld [vmem:[#allocation7 + $0x20] sm:$0xff]  ;;  %v973_v17 = vpack.c.bf16 %v219_v15, %v217_v14  ;;  %v218_v18 = vld [vmem:[#allocation7 + $0x30] sm:$0xff]  ;;  %v221_v19 = vld [vmem:[#allocation7 + $0x48] sm:$0xff]  ;;  %p1275_p0 = scmp.ne.s32.totalorder %s739_s5, %s1274_s22  ;;  %p1280_p2 = scmp.lt.s32.totalorder %s1274_s22, %s1274_s22 }
  0x82   :  { %966 = vmatprep.subr.bf16.mxu0 %v1317_v0  ;;  %v223_v20 = vld [vmem:[#allocation7 + $0x58] sm:$0xff]  ;;  %970 = vmatprep.subr.bf16.mxu1 %v969_v12  ;;  %v975_v21 = vpack.c.bf16 %v218_v18, %v216_v16  ;;  %v220_v24 = vld [vmem:[#allocation7 + $0x40] sm:$0xff]  ;;  %v222_v25 = vld [vmem:[#allocation7 + $0x50] sm:$0xff] }
  0x83   :  { %972 = vmatpush1.bf16.msra.mxu1 %v971_v13  ;;  %v123_v22 = vld [vmem:[#allocation2] sm:$0xff]  ;;  %v977_v23 = vpack.c.bf16 %v223_v20, %v221_v19  ;;  %v225_v26 = vld [vmem:[#allocation7 + $0x68] sm:$0xff]  ;;  %v979_v28 = vpack.c.bf16 %v222_v25, %v220_v24  ;;  %v224_v30 = vld [vmem:[#allocation7 + $0x60] sm:$0xff]  ;;  %p1281_p3 = por %p1280_p2, %p1279_p1 }
  0x84   :  { %974 = vmatprep.subr.bf16.mxu1 %v973_v17  ;;  %v227_v27 = vld [vmem:[#allocation7 + $0x78] sm:$0xff]  ;;  %v226_v31 = vld [vmem:[#allocation7 + $0x70] sm:$0xff]  ;;  %v229_v32 = vld [vmem:[#allocation7 + $0x88] sm:$0xff] }
  0x85   :  { %968 = vmatpush3.bf16.msra.mxu0 %v967_v11  ;;  %v981_v29 = vpack.c.bf16 %v227_v27, %v225_v26  ;;  %v231_v33 = vld [vmem:[#allocation7 + $0x98] sm:$0xff]  ;;  %v983_v34 = vpack.c.bf16 %v226_v31, %v224_v30  ;;  %v228_v36 = vld [vmem:[#allocation7 + $0x80] sm:$0xff]  ;;  %v230_v37 = vld [vmem:[#allocation7 + $0x90] sm:$0xff]  ;;  %p1282_p4 = pnand %p1281_p3, %p1275_p0 }
  0x86   :  { %v985_v35 = vpack.c.bf16 %v231_v33, %v229_v32  ;;  %v233_v38 = vld [vmem:[#allocation7 + $0xa8] sm:$0xff]  ;;  %v235_v39 = vld [vmem:[#allocation7 + $0xb8] sm:$0xff]  ;;  %v987_v40 = vpack.c.bf16 %v230_v37, %v228_v36  ;;  %v232_v42 = vld [vmem:[#allocation7 + $0xa0] sm:$0xff] }
  0x87   :  { %976 = vmatpush1.bf16.msra.mxu1 %v975_v21  ;;  %v989_v41 = vpack.c.bf16 %v235_v39, %v233_v38  ;;  %v234_v43 = vld [vmem:[#allocation7 + $0xb0] sm:$0xff]  ;;  %v237_v44 = vld [vmem:[#allocation7 + $0xc8] sm:$0xff]  ;;  %v239_v45 = vld [vmem:[#allocation7 + $0xd8] sm:$0xff] }
  0x88   :  { %856 = vmatmul.mubr.msk.f32.vlgmr.msra.gmra.mrb[0].mxu0 %vm135_vm1, %v123_v22  ;;  %978 = vmatprep.subr.bf16.mxu1 %v977_v23  ;;  %v991_v46 = vpack.c.bf16 %v234_v43, %v232_v42  ;;  %v993_v47 = vpack.c.bf16 %v239_v45, %v237_v44  ;;  %v236_v48 = vld [vmem:[#allocation7 + $0xc0] sm:$0xff]  ;;  %v238_v49 = vld [vmem:[#allocation7 + $0xd0] sm:$0xff]  ;;  %v241_v51 = vld [vmem:[#allocation7 + $0xe8] sm:$0xff] }
  0x89   :  { %v995_v50 = vpack.c.bf16 %v238_v49, %v236_v48  ;;  %v243_v52 = vld [vmem:[#allocation7 + $0xf8] sm:$0xff]  ;;  %v240_v54 = vld [vmem:[#allocation7 + $0xe0] sm:$0xff]  ;;  %v242_v55 = vld [vmem:[#allocation7 + $0xf0] sm:$0xff] }
  0x8a   :  { %v997_v53 = vpack.c.bf16 %v243_v52, %v241_v51  ;;  %v999_v56 = vpack.c.bf16 %v242_v55, %v240_v54  ;;  %v349_v57 = vld [vmem:[#allocation8 + $0x80] sm:$0xff]  ;;  %v350_v58 = vld [vmem:[#allocation8 + $0x88] sm:$0xff]  ;;  %v351_v62 = vld [vmem:[#allocation8 + $0x90] sm:$0xff] }
  0x8b   :  { %980 = vmatpush1.bf16.msra.mxu1 %v979_v28  ;;  %v333_v59 = vld [vmem:[#allocation8] sm:$0xff]  ;;  %v1001_v60 = vpack.c.bf16 %v350_v58, %v349_v57  ;;  %v334_v61 = vld [vmem:[#allocation8 + $0x8] sm:$0xff]  ;;  %v352_v63 = vld [vmem:[#allocation8 + $0x98] sm:$0xff] }
  0x8c   :  { %982 = vmatprep.subr.bf16.mxu1 %v981_v29  ;;  %v1003_v2 = vpack.c.bf16 %v334_v61, %v333_v59  ;;  %v1005_v3 = vpack.c.bf16 %v352_v63, %v351_v62  ;;  %v335_v4 = vld [vmem:[#allocation8 + $0x10] sm:$0xff]  ;;  %v336_v5 = vld [vmem:[#allocation8 + $0x18] sm:$0xff]  ;;  %v353_v6 = vld [vmem:[#allocation8 + $0xa0] sm:$0xff] }
  0x8d   :  { %1002 = vmatprep.subr.bf16.mxu0 %v1001_v60  ;;  %v354_v7 = vld [vmem:[#allocation8 + $0xa8] sm:$0xff]  ;;  %v1007_v8 = vpack.c.bf16 %v336_v5, %v335_v4  ;;  %v337_v10 = vld [vmem:[#allocation8 + $0x20] sm:$0xff]  ;;  %v355_v12 = vld [vmem:[#allocation8 + $0xb0] sm:$0xff]  ;;  %v246_v5 = vlaneseq }
  0x8e   :  { %1004 = vmatpush3.bf16.msra.mxu0 %v1003_v2  ;;  %v1009_v9 = vpack.c.bf16 %v354_v7, %v353_v6  ;;  %v338_v11 = vld [vmem:[#allocation8 + $0x28] sm:$0xff]  ;;  %v356_v13 = vld [vmem:[#allocation8 + $0xb8] sm:$0xff]  ;;  %v339_v16 = vld [vmem:[#allocation8 + $0x30] sm:$0xff] }
  0x8f   :  { %984 = vmatpush1.bf16.msra.mxu1 %v983_v34  ;;  %1006 = vmatprep.subr.bf16.mxu0 %v1005_v3  ;;  %v1011_v14 = vpack.c.bf16 %v338_v11, %v337_v10  ;;  %v1013_v15 = vpack.c.bf16 %v356_v13, %v355_v12  ;;  %v340_v17 = vld [vmem:[#allocation8 + $0x38] sm:$0xff]  ;;  %v357_v18 = vld [vmem:[#allocation8 + $0xc0] sm:$0xff]  ;;  %v358_v19 = vld [vmem:[#allocation8 + $0xc8] sm:$0xff]  ;;  %v247_v6 = vshrl.u32 %v246_v5, 7 }
  0x90   :  { %986 = vmatprep.subr.bf16.mxu1 %v985_v35  ;;  %v1015_v20 = vpack.c.bf16 %v340_v17, %v339_v16  ;;  %v1017_v21 = vpack.c.bf16 %v358_v19, %v357_v18  ;;  %v341_v22 = vld [vmem:[#allocation8 + $0x40] sm:$0xff]  ;;  %v342_v23 = vld [vmem:[#allocation8 + $0x48] sm:$0xff]  ;;  %v359_v24 = vld [vmem:[#allocation8 + $0xd0] sm:$0xff] }
  0x91   :  { %v360_v25 = vld [vmem:[#allocation8 + $0xd8] sm:$0xff]  ;;  %v1019_v26 = vpack.c.bf16 %v342_v23, %v341_v22  ;;  %v343_v28 = vld [vmem:[#allocation8 + $0x50] sm:$0xff]  ;;  %v361_v37 = vld [vmem:[#allocation8 + $0xe0] sm:$0xff]  ;;  %v248_v7 = vsub.s32 0, %v247_v6 }
  0x92   :  { %1008 = vmatpush3.bf16.msra.mxu0 %v1007_v8  ;;  %v1021_v27 = vpack.c.bf16 %v360_v25, %v359_v24  ;;  %v344_v29 = vld [vmem:[#allocation8 + $0x58] sm:$0xff]  ;;  %v362_v38 = vld [vmem:[#allocation8 + $0xe8] sm:$0xff]  ;;  %v363_v43 = vld [vmem:[#allocation8 + $0xf0] sm:$0xff] }
  0x93   :  { %988 = vmatpush1.bf16.msra.mxu1 %v987_v40  ;;  %1010 = vmatprep.subr.bf16.mxu0 %v1009_v9  ;;  %v1023_v30 = vpack.c.bf16 %v344_v29, %v343_v28  ;;  %v750_v31 = vld [vmem:[%s1537_s7] ss:$0 sm:$0xff]  ;;  %v1025_v39 = vpack.c.bf16 %v362_v38, %v361_v37  ;;  %v345_v40 = vld [vmem:[#allocation8 + $0x60] sm:$0xff]  ;;  %v447_v51 = vld [vmem:[#allocation10 + $0x10] sm:$0xff]  ;;  %v252_v9 = vsub.s32 1, %v247_v6 }
  0x94   :  { %990 = vmatprep.subr.bf16.mxu1 %v989_v41  ;;  %v346_v41 = vld [vmem:[#allocation8 + $0x68] sm:$0xff]  ;;  %v364_v44 = vld [vmem:[#allocation8 + $0xf8] sm:$0xff]  ;;  %v445_v49 = vld [vmem:[#allocation10] sm:$0xff] }
  0x95   :  { %v1027_v42 = vpack.c.bf16 %v346_v41, %v345_v40  ;;  %v1029_v45 = vpack.c.bf16 %v364_v44, %v363_v43  ;;  %v449_v55 = vld [vmem:[#allocation10 + $0x20] sm:$0xff]  ;;  %v451_v58 = vld [vmem:[#allocation10 + $0x30] sm:$0xff]  ;;  %v452_v59 = vld [vmem:[#allocation10 + $0x38] sm:$0xff] }
  0x96   :  { %1012 = vmatpush3.bf16.msra.mxu0 %v1011_v14  ;;  %v1043_v60 = vpack.c.bf16 %v452_v59, %v451_v58  ;;  %v453_v61 = vld [vmem:[#allocation10 + $0x40] sm:$0xff]  ;;  %v454_v62 = vld [vmem:[#allocation10 + $0x48] sm:$0xff]  ;;  %v455_v2 = vld [vmem:[#allocation10 + $0x50] sm:$0xff] }
  0x97   :  { %992 = vmatpush1.bf16.msra.mxu1 %v991_v46  ;;  %1014 = vmatprep.subr.bf16.mxu0 %v1013_v15  ;;  %v347_v46 = vld [vmem:[#allocation8 + $0x70] sm:$0xff]  ;;  %v1046_v63 = vpack.c.bf16 %v454_v62, %v453_v61  ;;  %v456_v3 = vld [vmem:[#allocation10 + $0x58] sm:$0xff]  ;;  %v549_v38 = vld [vmem:[#allocation11 + $0x40] sm:$0xff] }
  0x98   :  { %994 = vmatprep.subr.bf16.mxu1 %v993_v47  ;;  %v348_v47 = vld [vmem:[#allocation8 + $0x78] sm:$0xff]  ;;  %v1049_v4 = vpack.c.bf16 %v456_v3, %v455_v2  ;;  %v459_v23 = vld [vmem:[#allocation10 + $0x70] sm:$0xff]  ;;  %v553_v44 = vld [vmem:[#allocation11 + $0x60] sm:$0xff] }
  0x99   :  { %v1031_v48 = vpack.c.bf16 %v348_v47, %v347_v46  ;;  %v244_v8 = vld [vmem:[%s1537_s7 + $0x1] sm:$0x3]  ;;  %v543_v28 = vld [vmem:[#allocation11 + $0x10] sm:$0xff]  ;;  %v639_v58 = vld [vmem:[#allocation13 + $0x8] sm:$0xff] }
  0x9a   :  { %1016 = vmatpush3.bf16.msra.mxu0 %v1015_v20  ;;  %v249_v10 = vrot.slane %v244_v8, %v248_v7  ;;  %v253_v11 = vrot.slane %v244_v8, %v252_v9  ;;  %v457_v20 = vld [vmem:[#allocation10 + $0x60] sm:$0xff]  ;;  %v460_v24 = vld [vmem:[#allocation10 + $0x78] sm:$0xff]  ;;  %v551_v41 = vld [vmem:[#allocation11 + $0x50] sm:$0xff] }
  0x9b   :  { %996 = vmatpush1.bf16.msra.mxu1 %v995_v50  ;;  %1018 = vmatprep.subr.bf16.mxu0 %v1017_v21  ;;  %v446_v50 = vld [vmem:[#allocation10 + $0x8] sm:$0xff]  ;;  %v1055_v25 = vpack.c.bf16 %v460_v24, %v459_v23  ;;  %v640_v59 = vld [vmem:[#allocation13 + $0x10] sm:$0xff]  ;;  %v641_v61 = vld [vmem:[#allocation13 + $0x18] sm:$0xff] }
  0x9c   :  { %998 = vmatprep.subr.bf16.mxu1 %v997_v53  ;;  %v1034_v52 = vpack.c.bf16 %v446_v50, %v445_v49  ;;  %v448_v53 = vld [vmem:[#allocation10 + $0x18] sm:$0xff]  ;;  %v458_v21 = vld [vmem:[#allocation10 + $0x68] sm:$0xff]  ;;  %v1085_v62 = vpack.c.bf16 %v641_v61, %v640_v59  ;;  %v646_v6 = vld [vmem:[#allocation13 + $0x40] sm:$0xff] }
  0x9d   :  { %v1037_v54 = vpack.c.bf16 %v448_v53, %v447_v51  ;;  %v1052_v22 = vpack.c.bf16 %v458_v21, %v457_v20  ;;  %v643_v2 = vld [vmem:[#allocation13 + $0x28] sm:$0xff]  ;;  %v648_v9 = vld [vmem:[#allocation13 + $0x50] sm:$0xff]  ;;  %v754_v24 = vld [vmem:[%s1537_s7 + $0x5] ss:$0 sm:$0xff] }
  0x9e   :  { %1020 = vmatpush3.bf16.msra.mxu0 %v1019_v26  ;;  %v541_v26 = vld [vmem:[#allocation11] sm:$0xff]  ;;  %v647_v7 = vld [vmem:[#allocation13 + $0x48] sm:$0xff]  ;;  %v652_v21 = vld [vmem:[#allocation13 + $0x70] sm:$0xff] }
  0x9f   :  { %1000 = vmatpush1.bf16.msra.mxu1 %v999_v56  ;;  %1022 = vmatprep.subr.bf16.mxu0 %v1021_v27  ;;  %v450_v56 = vld [vmem:[#allocation10 + $0x28] sm:$0xff]  ;;  %v1094_v8 = vpack.c.bf16 %v647_v7, %v646_v6 }
  0xa0   :  { %1033 = vmatprep.subr.bf16.mxu1 %v1317_v0  ;;  %v1040_v57 = vpack.c.bf16 %v450_v56, %v449_v55  ;;  %v542_v27 = vld [vmem:[#allocation11 + $0x8] sm:$0xff]  ;;  %v556_v55 = vld [vmem:[#allocation11 + $0x78] sm:$0xff] }
  0xa1   :  { %v1058_v29 = vpack.c.bf16 %v542_v27, %v541_v26 }
  0xa2   :  { %1024 = vmatpush3.bf16.msra.mxu0 %v1023_v30  ;;  %v544_v30 = vld [vmem:[#allocation11 + $0x18] sm:$0xff] }
  0xa3   :  { %1026 = vmatprep.subr.bf16.mxu0 %v1025_v39  ;;  %v550_v39 = vld [vmem:[#allocation11 + $0x48] sm:$0xff] }
  0xa4   :  { %v1070_v40 = vpack.c.bf16 %v550_v39, %v549_v38 }
  0xa6   :  { %1028 = vmatpush3.bf16.msra.mxu0 %v1027_v42  ;;  %v552_v42 = vld [vmem:[#allocation11 + $0x58] sm:$0xff] }
  0xa7   :  { %1030 = vmatprep.subr.bf16.mxu0 %v1029_v45  ;;  %v1073_v43 = vpack.c.bf16 %v552_v42, %v551_v41  ;;  %v554_v45 = vld [vmem:[#allocation11 + $0x68] sm:$0xff] }
  0xa8   :  { %v1076_v46 = vpack.c.bf16 %v554_v45, %v553_v44 }
  0xaa   :  { %1032 = vmatpush3.bf16.msra.mxu0 %v1031_v48  ;;  %v752_v48 = vld [vmem:[%s1537_s7 + $0x3] ss:$0 sm:$0xff] }
  0xab   :  { %1057 = vmatprep.subr.bf16.mxu0 %v1317_v0 }
 0x15b   :  { %v205_v32 = vpop.f32.mrb[0].mxu0 }
 0x15c   :  { %v206_v33 = vadd.f32 %v750_v31, %v205_v32  ;;  %v857_v34 = vpop.f32.mrb[1].mxu0  ;;  %v1061_v31 = vpack.c.bf16 %v544_v30, %v543_v28  ;;  %v545_v32 = vld [vmem:[#allocation11 + $0x20] sm:$0xff] }
 0x15e   :  { %v210_v35 = vmul.f32 0.01, %v206_v33  ;;  %vm209_vm2 = vcmp.gt.f32.partialorder %v206_v33, 0.0 }
 0x160   :  { %v211_v36 = vsel %vm209_vm2, %v206_v33, %v210_v35  ;;  %v546_v33 = vld [vmem:[#allocation11 + $0x28] sm:$0xff]  ;;  %v547_v35 = vld [vmem:[#allocation11 + $0x30] sm:$0xff] }
 0x161   :  { %321 = vmatmul.mubr.f32.vlgmr.msra.gmra.mrb[0].mxu1 %v211_v36  ;;  %v1064_v34 = vpack.c.bf16 %v546_v33, %v545_v32  ;;  %v548_v36 = vld [vmem:[#allocation11 + $0x38] sm:$0xff] }
 0x162   :  { %890 = vmatprep.mubr.msk.f32.mxu1 %vm1318_vm0, %v1319_v1  ;;  %1035 = vmatpush3.bf16.msra.mxu1 %v1034_v52  ;;  %v1067_v37 = vpack.c.bf16 %v548_v36, %v547_v35 }
 0x163   :  { %1036 = vmatprep.subr.bf16.mxu1 %v1317_v0 }
 0x166   :  { %1038 = vmatpush3.bf16.msra.mxu1 %v1037_v54  ;;  %v555_v54 = vld [vmem:[#allocation11 + $0x70] sm:$0xff] }
 0x167   :  { %1039 = vmatprep.subr.bf16.mxu1 %v1317_v0  ;;  %v1079_v56 = vpack.c.bf16 %v556_v55, %v555_v54 }
 0x16a   :  { %1041 = vmatpush3.bf16.msra.mxu1 %v1040_v57  ;;  %v638_v57 = vld [vmem:[#allocation13] sm:$0xff] }
 0x16b   :  { %1042 = vmatprep.subr.bf16.mxu1 %v1317_v0 }
 0x16e   :  { %1044 = vmatpush3.bf16.msra.mxu1 %v1043_v60  ;;  %v1082_v60 = vpack.c.bf16 %v639_v58, %v638_v57 }
 0x16f   :  { %1045 = vmatprep.subr.bf16.mxu1 %v1317_v0 }
 0x172   :  { %1047 = vmatpush3.bf16.msra.mxu1 %v1046_v63  ;;  %v642_v63 = vld [vmem:[#allocation13 + $0x20] sm:$0xff] }
 0x173   :  { %1048 = vmatprep.subr.bf16.mxu1 %v1317_v0  ;;  %v1088_v3 = vpack.c.bf16 %v643_v2, %v642_v63 }
 0x176   :  { %1050 = vmatpush3.bf16.msra.mxu1 %v1049_v4  ;;  %v645_v4 = vld [vmem:[#allocation13 + $0x38] sm:$0xff] }
 0x177   :  { %1051 = vmatprep.subr.bf16.mxu1 %v1317_v0 }
 0x17a   :  { %1053 = vmatpush3.bf16.msra.mxu1 %v1052_v22  ;;  %v653_v22 = vld [vmem:[#allocation13 + $0x78] sm:$0xff] }
 0x17b   :  { %1054 = vmatprep.subr.bf16.mxu1 %v1317_v0  ;;  %v1103_v23 = vpack.c.bf16 %v653_v22, %v652_v21 }
 0x17e   :  { %1056 = vmatpush3.bf16.msra.mxu1 %v1055_v25 }
 0x17f   :  { %1081 = vmatprep.subr.bf16.mxu1 %v1317_v0 }
 0x234   :  { %v322_v12 = vpop.f32.mrb[0].mxu1 }
 0x235   :  { %v323_v13 = vadd.f32 %v322_v12, %v249_v10  ;;  %v324_v14 = vpop.f32.mrb[1].mxu1  ;;  %v649_v10 = vld [vmem:[#allocation13 + $0x58] sm:$0xff] }
 0x236   :  { %v325_v15 = vadd.f32 %v324_v14, %v253_v11  ;;  %v1097_v11 = vpack.c.bf16 %v649_v10, %v648_v9  ;;  %v753_v12 = vld [vmem:[%s1537_s7 + $0x4] ss:$0 sm:$0xff] }
 0x237   :  { %v329_v16 = vmul.f32 0.01, %v323_v13  ;;  %vm327_vm3 = vcmp.gt.f32.partialorder %v323_v13, 0.0 }
 0x238   :  { %v330_v17 = vmul.f32 0.01, %v325_v15  ;;  %vm328_vm4 = vcmp.gt.f32.partialorder %v325_v15, 0.0 }
 0x239   :  { %v331_v19 = vsel %vm327_vm3, %v323_v13, %v329_v16 }
 0x23a   :  { %v332_v18 = vsel %vm328_vm4, %v325_v15, %v330_v17 }
 0x23b   :  { %436 = vmatprep.mubr.f32.mxu0 %v332_v18  ;;  %v650_v18 = vld [vmem:[#allocation13 + $0x60] sm:$0xff] }
 0x23c   :  { %437 = vmatmul.mubr.f32.vlgmr.msra.gmra.mrb[2].mxu0 %v331_v19  ;;  %v651_v19 = vld [vmem:[#allocation13 + $0x68] sm:$0xff] }
 0x23d   :  { %925 = vmatprep.mubr.msk.f32.mxu0 %vm1318_vm0, %v1319_v1  ;;  %1059 = vmatpush3.bf16.msra.mxu0 %v1058_v29  ;;  %v1100_v20 = vpack.c.bf16 %v651_v19, %v650_v18 }
 0x23e   :  { %1060 = vmatprep.subr.bf16.mxu0 %v1317_v0 }
 0x241   :  { %1062 = vmatpush3.bf16.msra.mxu0 %v1061_v31 }
 0x242   :  { %1063 = vmatprep.subr.bf16.mxu0 %v1317_v0 }
 0x245   :  { %1065 = vmatpush3.bf16.msra.mxu0 %v1064_v34 }
 0x246   :  { %1066 = vmatprep.subr.bf16.mxu0 %v1317_v0 }
 0x249   :  { %1068 = vmatpush3.bf16.msra.mxu0 %v1067_v37 }
 0x24a   :  { %1069 = vmatprep.subr.bf16.mxu0 %v1317_v0 }
 0x24d   :  { %1071 = vmatpush3.bf16.msra.mxu0 %v1070_v40 }
 0x24e   :  { %1072 = vmatprep.subr.bf16.mxu0 %v1317_v0 }
 0x251   :  { %1074 = vmatpush3.bf16.msra.mxu0 %v1073_v43 }
 0x252   :  { %1075 = vmatprep.subr.bf16.mxu0 %v1317_v0 }
 0x255   :  { %1077 = vmatpush3.bf16.msra.mxu0 %v1076_v46 }
 0x256   :  { %1078 = vmatprep.subr.bf16.mxu0 %v1317_v0 }
 0x259   :  { %1080 = vmatpush3.bf16.msra.mxu0 %v1079_v56 }
 0x30f   :  { %v793_v47 = vpop.f32.mrb[2].mxu0 }
 0x310   :  { %v794_v49 = vpop.f32.mrb[3].mxu0 }
 0x311   :  { %v795_v50 = vadd.f32 %v794_v49, %v793_v47 }
 0x313   :  { %v439_v51 = vadd.f32 %v795_v50, %v752_v48 }
 0x315   :  { %v443_v52 = vmul.f32 0.01, %v439_v51  ;;  %vm442_vm5 = vcmp.gt.f32.partialorder %v439_v51, 0.0 }
 0x317   :  { %v444_v53 = vsel %vm442_vm5, %v439_v51, %v443_v52 }
 0x318   :  { %891 = vmatmul.mubr.f32.vlgmr.msra.gmra.mrb[2].mxu1 %v444_v53 }
 0x319   :  { %960 = vmatprep.mubr.msk.f32.mxu1 %vm1318_vm0, %v1319_v1  ;;  %1083 = vmatpush3.bf16.msra.mxu1 %v1082_v60  ;;  %v644_v1 = vld [vmem:[#allocation13 + $0x30] sm:$0xff] }
 0x31a   :  { %1084 = vmatprep.subr.bf16.mxu1 %v1317_v0  ;;  %v1091_v5 = vpack.c.bf16 %v645_v4, %v644_v1 }
 0x31d   :  { %1086 = vmatpush3.bf16.msra.mxu1 %v1085_v62 }
 0x31e   :  { %1087 = vmatprep.subr.bf16.mxu1 %v1317_v0 }
 0x321   :  { %1089 = vmatpush3.bf16.msra.mxu1 %v1088_v3 }
 0x322   :  { %1090 = vmatprep.subr.bf16.mxu1 %v1317_v0 }
 0x325   :  { %1092 = vmatpush3.bf16.msra.mxu1 %v1091_v5 }
 0x326   :  { %1093 = vmatprep.subr.bf16.mxu1 %v1317_v0 }
 0x329   :  { %1095 = vmatpush3.bf16.msra.mxu1 %v1094_v8 }
 0x32a   :  { %1096 = vmatprep.subr.bf16.mxu1 %v1317_v0 }
 0x32d   :  { %1098 = vmatpush3.bf16.msra.mxu1 %v1097_v11 }
 0x32e   :  { %1099 = vmatprep.subr.bf16.mxu1 %v1317_v0 }
 0x331   :  { %1101 = vmatpush3.bf16.msra.mxu1 %v1100_v20 }
 0x332   :  { %1102 = vmatprep.subr.bf16.mxu1 %v1317_v0  ;;  %v755_v0 = vld [vmem:[%s1537_s7 + $0x6] ss:$0 sm:$0xff] }
 0x335   :  { %1104 = vmatpush3.bf16.msra.mxu1 %v1103_v23 }
 0x3eb   :  { %v534_v13 = vpop.f32.mrb[2].mxu1 }
 0x3ec   :  { %v535_v14 = vadd.f32 %v753_v12, %v534_v13  ;;  %v892_v15 = vpop.f32.mrb[3].mxu1 }
 0x3ee   :  { %vm538_vm6 = vcmp.gt.f32.partialorder %v535_v14, 0.0  ;;  %v539_v16 = vmul.f32 0.01, %v535_v14 }
 0x3f0   :  { %v540_v17 = vsel %vm538_vm6, %v535_v14, %v539_v16 }
 0x3f1   :  { %926 = vmatmul.mubr.f32.vlgmr.msra.gmra.mrb[4].mxu0 %v540_v17 }
 0x4c4   :  { %v630_v25 = vpop.f32.mrb[4].mxu0 }
 0x4c5   :  { %v631_v26 = vadd.f32 %v754_v24, %v630_v25  ;;  %v927_v27 = vpop.f32.mrb[5].mxu0 }
 0x4c7   :  { %vm634_vm7 = vcmp.gt.f32.partialorder %v631_v26, 0.0  ;;  %v635_v28 = vmul.f32 0.01, %v631_v26 }
 0x4c9   :  { %v636_v29 = vsel %vm634_vm7, %v631_v26, %v635_v28 }
 0x4ca   :  { %v637_v30 = vadd.f32 %v636_v29, %v540_v17 }
 0x4cc   :  { %961 = vmatmul.mubr.f32.vlgmr.msra.gmra.mrb[4].mxu1 %v637_v30 }
 0x59f   :  { %v727_v31 = vpop.f32.mrb[4].mxu1 }
 0x5a0   :  { %v728_v32 = vadd.f32 %v755_v0, %v727_v31  ;;  %v962_v33 = vpop.f32.mrb[5].mxu1 }
 0x5a2   :  { %731 = vst [vmem:[#allocation14] sm:$0xff] %v728_v32 }
 0x5a3   :  { %1285 = shalt.err (!%p1282_p4)
}
 0x5a4   :  { %s1286_s25 = scalar_lea.hbm %s1538_s8, 128 }
 0x5a5   :  { %p1287_p5 = scmp.ne.s32.totalorder %s1538_s8, %s1286_s25  ;;  %p1290_p6 = scmp.lt.u32.totalorder %s1286_s25, %s1538_s8 }
 0x5a7   :  { %p1292_p7 = pnand %p1290_p6, %p1287_p5 }
 0x5a9   :  { %1295 = shalt.err (!%p1292_p7)
}
 0x5aa   :  { %741 = dma.vmem_to_hbm [thread:$0]  %s739_s5, 128, %s1538_s8, [#allocation4]  }
 0x5ab   :  { %1304 = dma.done.wait [#allocation4], 128  }
 0x5ac   :  { %1305 = vsyncadd [#allocation4], 4294967168 }
 0x5ad   :  { %745 = vsyncpa [#allocation3], 1 }
 0x5ae   :  { %746 = vsyncpa [#allocation6], 1 }
 0x5af   :  { %747 = vsyncpa [#allocation9], 1 }
 0x5b0   :  { %748 = vsyncpa [#allocation12], 1 }
 0x5b1   :  { %749 = vsyncpa [#allocation4], 1 }

</bundles_post_ra>
